<compile_context>
chip_gen: v5e
topology: v5e:2x2
jax: 0.10.0
libtpu: 0.0.40
codegen_flags: <defaults>
</compile_context>

<pallas_src>
import jax
import jax.numpy as jnp
from jax.experimental import pallas as pl
from jax.experimental.pallas import tpu as pltpu

EPS = 1e-5      # nn.BatchNorm1d default eps
TB = 256        # batch tile (rows per grid step)
LANE = 128      # lane width / feature padding quantum


def _round_up(x, m):
    return (x + m - 1) // m * m


def _pad_to(a, shape):
    pads = [(0, s - d) for d, s in zip(a.shape, shape)]
    return jnp.pad(a, pads)


# --------------------------------------------------------------------------
# Kernel: three dot+bias layers (BN already folded), relu, sigmoid.
# --------------------------------------------------------------------------
def mlp_kernel(x_ref, w1_ref, b1_ref, w2_ref, b2_ref, w3_ref, b3_ref, out_ref):
    cdt = w1_ref.dtype  # matmul compute dtype (f32 or bf16); accum is f32

    h = jnp.dot(x_ref[...], w1_ref[...],
                preferred_element_type=jnp.float32) + b1_ref[...]
    h = jnp.maximum(h, 0.0)

    h = jnp.dot(h.astype(cdt), w2_ref[...],
                preferred_element_type=jnp.float32) + b2_ref[...]
    h = jnp.maximum(h, 0.0)

    h = jnp.dot(h.astype(cdt), w3_ref[...],
                preferred_element_type=jnp.float32) + b3_ref[...]

    # sigmoid(h) = 1 / (1 + exp(-h)); exp + approx reciprocal run on the EUP.
    out_ref[...] = pl.reciprocal(1.0 + jnp.exp(-h), approx=True)


# --------------------------------------------------------------------------
# Host-side parameter preparation (run ONCE, not per forward call).
# --------------------------------------------------------------------------
def init_mlp_params(key, input_size, num_classes):
    """Mirrors MLP.initialize_weights(): Linear W ~ N(0, 0.01), b=0;
    BN weight=1, bias=0, running_mean=0, running_var=1."""
    k1, k2, k3 = jax.random.split(key, 3)
    f32 = jnp.float32
    return {
        # stored transposed relative to torch (in, out) so the kernel does x@W
        "w1": 0.01 * jax.random.normal(k1, (input_size, 10), f32),
        "b1": jnp.zeros((1, 10), f32),
        "g1": jnp.ones((1, 10), f32),
        "be1": jnp.zeros((1, 10), f32),
        "m1": jnp.zeros((1, 10), f32),
        "v1": jnp.ones((1, 10), f32),
        "w2": 0.01 * jax.random.normal(k2, (10, 5), f32),
        "b2": jnp.zeros((1, 5), f32),
        "g2": jnp.ones((1, 5), f32),
        "be2": jnp.zeros((1, 5), f32),
        "m2": jnp.zeros((1, 5), f32),
        "v2": jnp.ones((1, 5), f32),
        "w3": 0.01 * jax.random.normal(k3, (5, num_classes), f32),
        "b3": jnp.zeros((1, num_classes), f32),
    }


def prepare_params(params, input_size, num_classes, matmul_dtype=jnp.float32):
    """Fold eval-mode BatchNorm into the preceding linear, then zero-pad all
    feature dims to lane multiples.  Padded channels end up with w=0, b=0 so
    they stay exactly zero through relu and never leak into real outputs."""
    def fold(w, b, g, be, m, v):
        scale = g * jax.lax.rsqrt(v + EPS)          # (1, out)
        return w * scale, (b - m) * scale + be

    w1, b1 = fold(params["w1"], params["b1"], params["g1"],
                  params["be1"], params["m1"], params["v1"])
    w2, b2 = fold(params["w2"], params["b2"], params["g2"],
                  params["be2"], params["m2"], params["v2"])
    w3, b3 = params["w3"], params["b3"]

    Fp = _round_up(input_size, LANE)
    H1p, H2p = LANE, LANE                 # 10 -> 128, 5 -> 128
    Cp = _round_up(num_classes, LANE)

    w1 = _pad_to(w1, (Fp, H1p)).astype(matmul_dtype)
    b1 = _pad_to(b1, (1, H1p)).astype(jnp.float32)
    w2 = _pad_to(w2, (H1p, H2p)).astype(matmul_dtype)
    b2 = _pad_to(b2, (1, H2p)).astype(jnp.float32)
    w3 = _pad_to(w3, (H2p, Cp)).astype(matmul_dtype)
    b3 = _pad_to(b3, (1, Cp)).astype(jnp.float32)
    return (w1, b1, w2, b2, w3, b3)


# --------------------------------------------------------------------------
# Forward: pad x, launch the kernel tiled over batch, slice the result.
# --------------------------------------------------------------------------
def mlp_forward(x, padded_params, num_classes):
    w1, b1, w2, b2, w3, b3 = padded_params
    B, F = x.shape
    Fp = w1.shape[0]
    Cp = w3.shape[1]
    assert F <= Fp

    Bp = _round_up(B, TB)
    xp = _pad_to(x, (Bp, Fp)).astype(w1.dtype)

    grid = (Bp // TB,)
    x_spec = pl.BlockSpec((TB, Fp), lambda i: (i, 0))
    param_specs = [pl.BlockSpec(a.shape, lambda i: (0, 0)) for a in padded_params]
    out_spec = pl.BlockSpec((TB, Cp), lambda i: (i, 0))

    out_padded = pl.pallas_call(
        mlp_kernel,
        out_shape=jax.ShapeDtypeStruct((Bp, Cp), jnp.float32),
        grid_spec=pl.GridSpec(grid=grid,
                              in_specs=[x_spec] + param_specs,
                              out_specs=out_spec),
        compiler_params=pltpu.CompilerParams(
            dimension_semantics=("parallel",)),
    )(xp, *padded_params)

    return out_padded[:B, :num_classes]


# --------------------------------------------------------------------------
# Pure-JAX reference of the same (eval-mode) forward pass, unfolded BN.
# --------------------------------------------------------------------------
def mlp_reference(x, p):
    h = x @ p["w1"] + p["b1"]
    h = (h - p["m1"]) * jax.lax.rsqrt(p["v1"] + EPS) * p["g1"] + p["be1"]
    h = jnp.maximum(h, 0.0)
    h = h @ p["w2"] + p["b2"]
    h = (h - p["m2"]) * jax.lax.rsqrt(p["v2"] + EPS) * p["g2"] + p["be2"]
    h = jnp.maximum(h, 0.0)
    h = h @ p["w3"] + p["b3"]
    return jax.nn.sigmoid(h)


if __name__ == "__main__":
    key = jax.random.PRNGKey(0)
    k_x, k_p = jax.random.split(key)

    batch, input_size, num_classes = 8, 32, 4
    x = jax.random.normal(k_x, (batch, input_size), jnp.float32)
    params = init_mlp_params(k_p, input_size, num_classes)

    # Fold BN + pad once, outside the per-call path.
    # (Use matmul_dtype=jnp.bfloat16 on v6e/v7x for the HBM-bound regime.)
    padded_params = prepare_params(params, input_size, num_classes,
                                   matmul_dtype=jnp.float32)
    padded_params = jax.block_until_ready(padded_params)

    out = mlp_forward(x, padded_params, num_classes)
    out = jax.block_until_ready(out)

    ref = mlp_reference(x, params)
    assert out.shape == (batch, num_classes)
    # Tolerance loosened slightly vs. bit-exact because the sigmoid divide
    # uses the EUP approximate reciprocal; outputs live in [0, 1].
    assert jnp.allclose(out, ref, atol=2e-3, rtol=2e-3), "kernel/reference mismatch"

    print("KERNEL_OK")
</pallas_src>

<mosaic_0001>
module attributes {stable_mosaic.version = 11 : i64} {
  func.func @mlp_kernel(%arg0: i32, %arg1: memref<256x128xf32, #tpu.memory_space<vmem>>, %arg2: memref<128x128xf32, #tpu.memory_space<vmem>>, %arg3: memref<1x128xf32, #tpu.memory_space<vmem>>, %arg4: memref<128x128xf32, #tpu.memory_space<vmem>>, %arg5: memref<1x128xf32, #tpu.memory_space<vmem>>, %arg6: memref<128x128xf32, #tpu.memory_space<vmem>>, %arg7: memref<1x128xf32, #tpu.memory_space<vmem>>, %arg8: memref<256x128xf32, #tpu.memory_space<vmem>>) attributes {dimension_semantics = [#tpu.dimension_semantics<parallel>], iteration_bounds = array<i64: 1>, scalar_prefetch = 0 : i64, scratch_operands = 0 : i64, tpu.core_type = #tpu.core_type<tc>, window_params = [{transform_indices = @transform_0, window_bounds = array<i64: 256, 128>}, {pipeline_mode = #tpu.pipeline_mode<synchronous>, transform_indices = @transform_1, window_bounds = array<i64: 128, 128>}, {pipeline_mode = #tpu.pipeline_mode<synchronous>, transform_indices = @transform_2, window_bounds = array<i64: 1, 128>}, {pipeline_mode = #tpu.pipeline_mode<synchronous>, transform_indices = @transform_3, window_bounds = array<i64: 128, 128>}, {pipeline_mode = #tpu.pipeline_mode<synchronous>, transform_indices = @transform_4, window_bounds = array<i64: 1, 128>}, {pipeline_mode = #tpu.pipeline_mode<synchronous>, transform_indices = @transform_5, window_bounds = array<i64: 128, 128>}, {pipeline_mode = #tpu.pipeline_mode<synchronous>, transform_indices = @transform_6, window_bounds = array<i64: 1, 128>}, {transform_indices = @transform_7, window_bounds = array<i64: 256, 128>}]} {
    %c0 = arith.constant 0 : index
    %c0_0 = arith.constant 0 : index
    %0 = vector.load %arg1[%c0, %c0_0] : memref<256x128xf32, #tpu.memory_space<vmem>>, vector<256x128xf32>
    %c0_1 = arith.constant 0 : index
    %c0_2 = arith.constant 0 : index
    %1 = vector.load %arg2[%c0_1, %c0_2] : memref<128x128xf32, #tpu.memory_space<vmem>>, vector<128x128xf32>
    %cst = arith.constant dense<0.000000e+00> : vector<256x128xf32>
    %2 = tpu.matmul %0, %1, %cst {dimension_numbers = #tpu.dot_dimension_numbers<[1], [0], [0], [1], [0, 0, 1, 1], [], []>} : vector<256x128xf32>, vector<128x128xf32>, vector<256x128xf32> -> vector<256x128xf32>
    %c0_3 = arith.constant 0 : index
    %c0_4 = arith.constant 0 : index
    %3 = vector.load %arg3[%c0_3, %c0_4] : memref<1x128xf32, #tpu.memory_space<vmem>>, vector<1x128xf32>
    %4 = vector.broadcast %3 : vector<1x128xf32> to vector<256x128xf32>
    %5 = arith.addf %2, %4 : vector<256x128xf32>
    %cst_5 = arith.constant 0.000000e+00 : f32
    %6 = vector.broadcast %cst_5 : f32 to vector<256x128xf32>
    %7 = arith.maximumf %5, %6 : vector<256x128xf32>
    %c0_6 = arith.constant 0 : index
    %c0_7 = arith.constant 0 : index
    %8 = vector.load %arg4[%c0_6, %c0_7] : memref<128x128xf32, #tpu.memory_space<vmem>>, vector<128x128xf32>
    %cst_8 = arith.constant dense<0.000000e+00> : vector<256x128xf32>
    %9 = tpu.matmul %7, %8, %cst_8 {dimension_numbers = #tpu.dot_dimension_numbers<[1], [0], [0], [1], [0, 0, 1, 1], [], []>} : vector<256x128xf32>, vector<128x128xf32>, vector<256x128xf32> -> vector<256x128xf32>
    %c0_9 = arith.constant 0 : index
    %c0_10 = arith.constant 0 : index
    %10 = vector.load %arg5[%c0_9, %c0_10] : memref<1x128xf32, #tpu.memory_space<vmem>>, vector<1x128xf32>
    %11 = vector.broadcast %10 : vector<1x128xf32> to vector<256x128xf32>
    %12 = arith.addf %9, %11 : vector<256x128xf32>
    %cst_11 = arith.constant 0.000000e+00 : f32
    %13 = vector.broadcast %cst_11 : f32 to vector<256x128xf32>
    %14 = arith.maximumf %12, %13 : vector<256x128xf32>
    %c0_12 = arith.constant 0 : index
    %c0_13 = arith.constant 0 : index
    %15 = vector.load %arg6[%c0_12, %c0_13] : memref<128x128xf32, #tpu.memory_space<vmem>>, vector<128x128xf32>
    %cst_14 = arith.constant dense<0.000000e+00> : vector<256x128xf32>
    %16 = tpu.matmul %14, %15, %cst_14 {dimension_numbers = #tpu.dot_dimension_numbers<[1], [0], [0], [1], [0, 0, 1, 1], [], []>} : vector<256x128xf32>, vector<128x128xf32>, vector<256x128xf32> -> vector<256x128xf32>
    %c0_15 = arith.constant 0 : index
    %c0_16 = arith.constant 0 : index
    %17 = vector.load %arg7[%c0_15, %c0_16] : memref<1x128xf32, #tpu.memory_space<vmem>>, vector<1x128xf32>
    %18 = vector.broadcast %17 : vector<1x128xf32> to vector<256x128xf32>
    %19 = arith.addf %16, %18 : vector<256x128xf32>
    %cst_17 = arith.constant 0.000000e+00 : f32
    %20 = vector.broadcast %cst_17 : f32 to vector<256x128xf32>
    %21 = arith.subf %20, %19 : vector<256x128xf32>
    %22 = math.exp %21 : vector<256x128xf32>
    %cst_18 = arith.constant 1.000000e+00 : f32
    %23 = vector.broadcast %cst_18 : f32 to vector<256x128xf32>
    %24 = arith.addf %23, %22 : vector<256x128xf32>
    %25 = tpu.reciprocal %24 {approx = true} : vector<256x128xf32> -> vector<256x128xf32>
    %c0_19 = arith.constant 0 : index
    %c0_20 = arith.constant 0 : index
    %26 = vector.load %arg8[%c0_19, %c0_20] : memref<256x128xf32, #tpu.memory_space<vmem>>, vector<256x128xf32>
    tpu.vector_store %arg8[%c0_19, %c0_20], %25 {strides = array<i32>} : memref<256x128xf32, #tpu.memory_space<vmem>>, vector<256x128xf32>,
    return
  }
  func.func @transform_0(%arg0: i32) -> (i32, i32) {
    %c0_i32 = arith.constant 0 : i32
    %c0_i32_0 = arith.constant 0 : i32
    return %arg0, %c0_i32 : i32, i32
  }
  func.func @transform_1(%arg0: i32) -> (i32, i32) {
    %c0_i32 = arith.constant 0 : i32
    %c0_i32_0 = arith.constant 0 : i32
    %c0_i32_1 = arith.constant 0 : i32
    return %c0_i32, %c0_i32_0 : i32, i32
  }
  func.func @transform_2(%arg0: i32) -> (i32, i32) {
    %c0_i32 = arith.constant 0 : i32
    %c0_i32_0 = arith.constant 0 : i32
    %c0_i32_1 = arith.constant 0 : i32
    return %c0_i32, %c0_i32_0 : i32, i32
  }
  func.func @transform_3(%arg0: i32) -> (i32, i32) {
    %c0_i32 = arith.constant 0 : i32
    %c0_i32_0 = arith.constant 0 : i32
    %c0_i32_1 = arith.constant 0 : i32
    return %c0_i32, %c0_i32_0 : i32, i32
  }
  func.func @transform_4(%arg0: i32) -> (i32, i32) {
    %c0_i32 = arith.constant 0 : i32
    %c0_i32_0 = arith.constant 0 : i32
    %c0_i32_1 = arith.constant 0 : i32
    return %c0_i32, %c0_i32_0 : i32, i32
  }
  func.func @transform_5(%arg0: i32) -> (i32, i32) {
    %c0_i32 = arith.constant 0 : i32
    %c0_i32_0 = arith.constant 0 : i32
    %c0_i32_1 = arith.constant 0 : i32
    return %c0_i32, %c0_i32_0 : i32, i32
  }
  func.func @transform_6(%arg0: i32) -> (i32, i32) {
    %c0_i32 = arith.constant 0 : i32
    %c0_i32_0 = arith.constant 0 : i32
    %c0_i32_1 = arith.constant 0 : i32
    return %c0_i32, %c0_i32_0 : i32, i32
  }
  func.func @transform_7(%arg0: i32) -> (i32, i32) {
    %c0_i32 = arith.constant 0 : i32
    %c0_i32_0 = arith.constant 0 : i32
    return %arg0, %c0_i32 : i32, i32
  }
}

</mosaic_0001>

<bundles_post_ra>
// kernel: tpu_custom_call.1
= control target key start
LH: loop header
LB: loop body
LE: loop exit
PB: predicated region body
PF: predicated region fallthrough
CT: control target
= control target key end

     0   :  { %12 = vsyncpa [#allocation3], 0  ;;  %s1300_s0 = inlined_call_operand.hbm [shape: f32[256,128], index: 0, kind: input, shape index: {}]   ;;  %s1301_s1 = inlined_call_operand.hbm [shape: f32[128,128], index: 1, kind: input, shape index: {}]   ;;  %s1302_s2 = inlined_call_operand.vmem [shape: f32[1,128], index: 2, kind: input, shape index: {}]   ;;  %s1303_s3 = inlined_call_operand.hbm [shape: f32[128,128], index: 3, kind: input, shape index: {}]   ;;  %s1304_s4 = inlined_call_operand.vmem [shape: f32[1,128], index: 4, kind: input, shape index: {}]   ;;  %s1305_s5 = inlined_call_operand.hbm [shape: f32[128,128], index: 5, kind: input, shape index: {}]   ;;  %s1306_s6 = inlined_call_operand.vmem [shape: f32[1,128], index: 6, kind: input, shape index: {}]   ;;  %s1307_s7 = inlined_call_operand.hbm [shape: f32[256,128], index: 7, kind: output, shape index: {}]  }
   0x1   :  { %13 = vsyncpa [#allocation6], 0 }
   0x2   :  { %14 = vsyncpa [#allocation9], 0 }
   0x3   :  { %15 = vsyncpa [#allocation4], 0  ;;  %s33_s26 = sshll.u32 %s1301_s1, 4  ;;  %s1112_s27 = smov [#allocation5]   ;;  %s34_s26 = int_to_ptr.hbm [resolvable:$true] %s33_s26 }
   0x4   :  { %s35_s28 = sshll.u32 %s1112_s27, 4  ;;  %s20_s8 = sshll.u32 %s1300_s0, 4  ;;  %s36_s28 = int_to_ptr.vmem [resolvable:$true] %s35_s28  ;;  %s21_s8 = int_to_ptr.hbm [resolvable:$true] %s20_s8 }
   0x5   :  { %s1113_s9 = smov 128   ;;  %s1114_s10 = smov 8  }
   0x6   :  { %41 = dma.hbm_to_vmem [thread:$0]  %s34_s26, 2048, %s36_s28, [#allocation6], %s1113_s9, %s1113_s9, %s1114_s10  }
   0x7   :  { %s1115_s11 = smov [#allocation2]   ;;  %s48_s1 = sshll.u32 %s1303_s3, 4  ;;  %s49_s1 = int_to_ptr.hbm [resolvable:$true] %s48_s1 }
   0x8   :  { %s22_s12 = sshll.u32 %s1115_s11, 4  ;;  %s63_s16 = sshll.u32 %s1305_s5, 4  ;;  %s23_s12 = int_to_ptr.vmem [resolvable:$true] %s22_s12  ;;  %s64_s16 = int_to_ptr.hbm [resolvable:$true] %s63_s16 }
   0x9   :  { %28 = dma.hbm_to_vmem [thread:$0]  %s21_s8, 4096, %s23_s12, [#allocation3], %s1113_s9, %s1113_s9, %s1114_s10  }
   0xa   :  { %s1116_s17 = smov [#allocation7]   ;;  %s1117_s19 = smov [#allocation8]  }
   0xb   :  { %s50_s18 = sshll.u32 %s1116_s17, 4  ;;  %s65_s3 = sshll.u32 %s1117_s19, 4  ;;  %s51_s18 = int_to_ptr.vmem [resolvable:$true] %s50_s18  ;;  %s66_s3 = int_to_ptr.vmem [resolvable:$true] %s65_s3 }
   0xc   :  { %56 = dma.hbm_to_vmem [thread:$0]  %s49_s1, 2048, %s51_s18, [#allocation6], %s1113_s9, %s1113_s9, %s1114_s10  }
   0xd   :  { %71 = dma.hbm_to_vmem [thread:$0]  %s64_s16, 2048, %s66_s3, [#allocation9], %s1113_s9, %s1113_s9, %s1114_s10  }
   0xe   :  { %1104 = dma.done.wait [#allocation3], 4096  }
   0xf   :  { %1105 = vsyncadd [#allocation3], 4294963200 }
  0x10   :  { %1106 = dma.done.wait [#allocation6], 4096  }
  0x11   :  { %1107 = vsyncadd [#allocation6], 4294963200 }
  0x12   :  { %1108 = dma.done.wait [#allocation9], 2048  }
  0x13   :  { %1109 = vsyncadd [#allocation9], 4294965248  ;;  %v137_v0 = vld [vmem:[#allocation5 + $0x78] sm:$0xff]  ;;  %v136_v1 = vld [vmem:[#allocation5 + $0x70] sm:$0xff]  ;;  %s783_s26 = sshll.u32 %s1307_s7, 4  ;;  %s784_s26 = int_to_ptr.hbm [resolvable:$true] %s783_s26 }
  0x14   :  { %142 = vmatpush.msra.mxu0 %v137_v0  ;;  %798 = vmatpush.msra.mxu3 %v137_v0  ;;  %v135_v2 = vld [vmem:[#allocation5 + $0x68] sm:$0xff]  ;;  %v134_v3 = vld [vmem:[#allocation5 + $0x60] sm:$0xff]  ;;  %v133_v4 = vld [vmem:[#allocation5 + $0x58] sm:$0xff] }
  0x15   :  { %v132_v5 = vld [vmem:[#allocation5 + $0x50] sm:$0xff]  ;;  %v131_v6 = vld [vmem:[#allocation5 + $0x48] sm:$0xff]  ;;  %v130_v7 = vld [vmem:[#allocation5 + $0x40] sm:$0xff] }
  0x16   :  { %143 = vmatpush.msra.mxu0 %v136_v1  ;;  %799 = vmatpush.msra.mxu3 %v136_v1  ;;  %v129_v8 = vld [vmem:[#allocation5 + $0x38] sm:$0xff]  ;;  %v128_v9 = vld [vmem:[#allocation5 + $0x30] sm:$0xff]  ;;  %v127_v10 = vld [vmem:[#allocation5 + $0x28] sm:$0xff] }
  0x17   :  { %v126_v11 = vld [vmem:[#allocation5 + $0x20] sm:$0xff]  ;;  %v125_v12 = vld [vmem:[#allocation5 + $0x18] sm:$0xff]  ;;  %v124_v13 = vld [vmem:[#allocation5 + $0x10] sm:$0xff] }
  0x18   :  { %144 = vmatpush.msra.mxu0 %v135_v2  ;;  %800 = vmatpush.msra.mxu3 %v135_v2  ;;  %v123_v14 = vld [vmem:[#allocation5 + $0x8] sm:$0xff]  ;;  %v122_v15 = vld [vmem:[#allocation5] sm:$0xff]  ;;  %v92_v18 = vld [vmem:[#allocation2 + $0x10] sm:$0xff] }
  0x19   :  { %v90_v16 = vld [vmem:[#allocation2] sm:$0xff]  ;;  %v91_v17 = vld [vmem:[#allocation2 + $0x8] sm:$0xff]  ;;  %v93_v19 = vld [vmem:[#allocation2 + $0x18] sm:$0xff] }
  0x1a   :  { %145 = vmatpush.msra.mxu0 %v134_v3  ;;  %801 = vmatpush.msra.mxu3 %v134_v3  ;;  %v94_v20 = vld [vmem:[#allocation2 + $0x20] sm:$0xff]  ;;  %v95_v21 = vld [vmem:[#allocation2 + $0x28] sm:$0xff]  ;;  %v96_v22 = vld [vmem:[#allocation2 + $0x30] sm:$0xff] }
  0x1b   :  { %v97_v23 = vld [vmem:[#allocation2 + $0x38] sm:$0xff]  ;;  %v98_v24 = vld [vmem:[#allocation2 + $0x40] sm:$0xff]  ;;  %v301_v26 = vld [vmem:[#allocation7 + $0x70] sm:$0xff] }
  0x1c   :  { %146 = vmatpush.msra.mxu0 %v133_v4  ;;  %802 = vmatpush.msra.mxu3 %v133_v4  ;;  %v302_v25 = vld [vmem:[#allocation7 + $0x78] sm:$0xff]  ;;  %v300_v27 = vld [vmem:[#allocation7 + $0x68] sm:$0xff]  ;;  %v299_v29 = vld [vmem:[#allocation7 + $0x60] sm:$0xff] }
  0x1d   :  { %307 = vmatpush.msra.mxu1 %v302_v25  ;;  %v99_v28 = vld [vmem:[#allocation2 + $0x48] sm:$0xff]  ;;  %v298_v30 = vld [vmem:[#allocation7 + $0x58] sm:$0xff]  ;;  %v297_v31 = vld [vmem:[#allocation7 + $0x50] sm:$0xff] }
  0x1e   :  { %147 = vmatpush.msra.mxu0 %v132_v5  ;;  %803 = vmatpush.msra.mxu3 %v132_v5  ;;  %v296_v32 = vld [vmem:[#allocation7 + $0x48] sm:$0xff]  ;;  %v100_v33 = vld [vmem:[#allocation2 + $0x50] sm:$0xff]  ;;  %v295_v34 = vld [vmem:[#allocation7 + $0x40] sm:$0xff] }
  0x1f   :  { %308 = vmatpush.msra.mxu1 %v301_v26  ;;  %v294_v35 = vld [vmem:[#allocation7 + $0x38] sm:$0xff]  ;;  %v114_v36 = vld [vmem:[#allocation2 + $0xc0] sm:$0xff]  ;;  %v293_v37 = vld [vmem:[#allocation7 + $0x30] sm:$0xff] }
  0x20   :  { %148 = vmatpush.msra.mxu0 %v131_v6  ;;  %804 = vmatpush.msra.mxu3 %v131_v6  ;;  %v292_v38 = vld [vmem:[#allocation7 + $0x28] sm:$0xff]  ;;  %v101_v39 = vld [vmem:[#allocation2 + $0x58] sm:$0xff]  ;;  %v291_v40 = vld [vmem:[#allocation7 + $0x20] sm:$0xff] }
  0x21   :  { %309 = vmatpush.msra.mxu1 %v300_v27  ;;  %v290_v41 = vld [vmem:[#allocation7 + $0x18] sm:$0xff]  ;;  %v115_v42 = vld [vmem:[#allocation2 + $0xc8] sm:$0xff]  ;;  %v289_v43 = vld [vmem:[#allocation7 + $0x10] sm:$0xff] }
  0x22   :  { %149 = vmatpush.msra.mxu0 %v130_v7  ;;  %805 = vmatpush.msra.mxu3 %v130_v7  ;;  %v102_v44 = vld [vmem:[#allocation2 + $0x60] sm:$0xff]  ;;  %v288_v45 = vld [vmem:[#allocation7 + $0x8] sm:$0xff]  ;;  %v116_v47 = vld [vmem:[#allocation2 + $0xd0] sm:$0xff] }
  0x23   :  { %310 = vmatpush.msra.mxu1 %v299_v29  ;;  %v287_v46 = vld [vmem:[#allocation7] sm:$0xff]  ;;  %v103_v48 = vld [vmem:[#allocation2 + $0x68] sm:$0xff]  ;;  %v117_v49 = vld [vmem:[#allocation2 + $0xd8] sm:$0xff] }
  0x24   :  { %150 = vmatpush.msra.mxu0 %v129_v8  ;;  %806 = vmatpush.msra.mxu3 %v129_v8  ;;  %v104_v50 = vld [vmem:[#allocation2 + $0x70] sm:$0xff]  ;;  %v118_v51 = vld [vmem:[#allocation2 + $0xe0] sm:$0xff]  ;;  %v105_v52 = vld [vmem:[#allocation2 + $0x78] sm:$0xff] }
  0x25   :  { %311 = vmatpush.msra.mxu1 %v298_v30  ;;  %v1186_v53 = vld [vmem:[%s1302_s2] ss:$0 sm:$0xff]  ;;  %v119_v54 = vld [vmem:[#allocation2 + $0xe8] sm:$0xff]  ;;  %v120_v59 = vld [vmem:[#allocation2 + $0xf0] sm:$0xff] }
  0x26   :  { %151 = vmatpush.msra.mxu0 %v128_v9  ;;  %807 = vmatpush.msra.mxu3 %v128_v9  ;;  %v106_v56 = vld [vmem:[#allocation2 + $0x80] sm:$0xff]  ;;  %v107_v61 = vld [vmem:[#allocation2 + $0x88] sm:$0xff]  ;;  %v121_v0 = vld [vmem:[#allocation2 + $0xf8] sm:$0xff] }
  0x27   :  { %312 = vmatpush.msra.mxu1 %v297_v31  ;;  %v108_v2 = vld [vmem:[#allocation2 + $0x90] sm:$0xff]  ;;  %v109_v6 = vld [vmem:[#allocation2 + $0x98] sm:$0xff] }
  0x28   :  { %152 = vmatpush.msra.mxu0 %v127_v10  ;;  %808 = vmatpush.msra.mxu3 %v127_v10  ;;  %v110_v10 = vld [vmem:[#allocation2 + $0xa0] sm:$0xff] }
  0x29   :  { %313 = vmatpush.msra.mxu1 %v296_v32 }
  0x2a   :  { %153 = vmatpush.msra.mxu0 %v126_v11  ;;  %809 = vmatpush.msra.mxu3 %v126_v11 }
  0x2b   :  { %314 = vmatpush.msra.mxu1 %v295_v34 }
  0x2c   :  { %154 = vmatpush.msra.mxu0 %v125_v12  ;;  %810 = vmatpush.msra.mxu3 %v125_v12 }
  0x2d   :  { %315 = vmatpush.msra.mxu1 %v294_v35 }
  0x2e   :  { %155 = vmatpush.msra.mxu0 %v124_v13  ;;  %811 = vmatpush.msra.mxu3 %v124_v13 }
  0x2f   :  { %316 = vmatpush.msra.mxu1 %v293_v37 }
  0x30   :  { %156 = vmatpush.msra.mxu0 %v123_v14  ;;  %812 = vmatpush.msra.mxu3 %v123_v14  ;;  %v111_v14 = vld [vmem:[#allocation2 + $0xa8] sm:$0xff] }
  0x31   :  { %317 = vmatpush.msra.mxu1 %v292_v38 }
  0x32   :  { %157 = vmatpush.msra.mxu0 %v122_v15  ;;  %813 = vmatpush.msra.mxu3 %v122_v15 }
  0x33   :  { %158 = vmatmul.f32.vlgmr.msra.gmra.mxu0 %v90_v16  ;;  %230 = vmatmul.f32.vlgmr.msra.gmra.mxu3 %v114_v36 }
  0x34   :  { %814 = vmatpush.msrb.mxu3 %v302_v25  ;;  %318 = vmatpush.msra.mxu1 %v291_v40 }
  0x36   :  { %815 = vmatpush.msrb.mxu3 %v301_v26  ;;  %319 = vmatpush.msra.mxu1 %v290_v41 }
  0x38   :  { %816 = vmatpush.msrb.mxu3 %v300_v27  ;;  %320 = vmatpush.msra.mxu1 %v289_v43 }
  0x3a   :  { %817 = vmatpush.msrb.mxu3 %v299_v29  ;;  %321 = vmatpush.msra.mxu1 %v288_v45 }
  0x3b   :  { %161 = vmatmul.f32.gmra.mxu0 %v91_v17  ;;  %233 = vmatmul.f32.gmra.mxu3 %v115_v42  ;;  %v459_v42 = vld [vmem:[#allocation8 + $0x38] sm:$0xff] }
  0x3c   :  { %818 = vmatpush.msrb.mxu3 %v298_v30  ;;  %322 = vmatpush.msra.mxu1 %v287_v46 }
  0x3e   :  { %819 = vmatpush.msrb.mxu3 %v297_v31  ;;  %v466_v31 = vld [vmem:[#allocation8 + $0x70] sm:$0xff] }
  0x40   :  { %820 = vmatpush.msrb.mxu3 %v296_v32 }
  0x42   :  { %821 = vmatpush.msrb.mxu3 %v295_v34  ;;  %v464_v34 = vld [vmem:[#allocation8 + $0x60] sm:$0xff] }
  0x43   :  { %164 = vmatmul.f32.gmra.mxu0 %v92_v18  ;;  %236 = vmatmul.f32.gmra.mxu3 %v116_v47  ;;  %v112_v18 = vld [vmem:[#allocation2 + $0xb0] sm:$0xff] }
  0x44   :  { %822 = vmatpush.msrb.mxu3 %v294_v35  ;;  %v463_v35 = vld [vmem:[#allocation8 + $0x58] sm:$0xff] }
  0x46   :  { %823 = vmatpush.msrb.mxu3 %v293_v37 }
  0x48   :  { %824 = vmatpush.msrb.mxu3 %v292_v38  ;;  %v462_v38 = vld [vmem:[#allocation8 + $0x50] sm:$0xff] }
  0x4a   :  { %825 = vmatpush.msrb.mxu3 %v291_v40  ;;  %v461_v40 = vld [vmem:[#allocation8 + $0x48] sm:$0xff] }
  0x4b   :  { %167 = vmatmul.f32.gmra.mxu0 %v93_v19  ;;  %239 = vmatmul.f32.gmra.mxu3 %v117_v49  ;;  %v457_v49 = vld [vmem:[#allocation8 + $0x28] sm:$0xff] }
  0x4c   :  { %826 = vmatpush.msrb.mxu3 %v290_v41  ;;  %v460_v41 = vld [vmem:[#allocation8 + $0x40] sm:$0xff] }
  0x4e   :  { %827 = vmatpush.msrb.mxu3 %v289_v43 }
  0x50   :  { %828 = vmatpush.msrb.mxu3 %v288_v45  ;;  %v458_v45 = vld [vmem:[#allocation8 + $0x30] sm:$0xff] }
  0x52   :  { %829 = vmatpush.msrb.mxu3 %v287_v46 }
  0x53   :  { %170 = vmatmul.f32.gmra.mxu0 %v94_v20  ;;  %242 = vmatmul.f32.gmra.mxu3 %v118_v51  ;;  %v456_v51 = vld [vmem:[#allocation8 + $0x20] sm:$0xff] }
  0x5b   :  { %173 = vmatmul.f32.gmra.mxu0 %v95_v21  ;;  %245 = vmatmul.f32.gmra.mxu3 %v119_v54 }
  0x63   :  { %176 = vmatmul.f32.gmra.mxu0 %v96_v22  ;;  %248 = vmatmul.f32.gmra.mxu3 %v120_v59  ;;  %v113_v22 = vld [vmem:[#allocation2 + $0xb8] sm:$0xff] }
  0x6b   :  { %179 = vmatmul.f32.gmra.mxu0 %v97_v23  ;;  %251 = vmatmul.f32.gmra.mxu3 %v121_v0 }
  0x73   :  { %182 = vmatmul.f32.gmra.mxu0 %v98_v24 }
  0x7b   :  { %185 = vmatmul.f32.gmra.mxu0 %v99_v28  ;;  %v467_v28 = vld [vmem:[#allocation8 + $0x78] sm:$0xff] }
  0x7c   :  { %472 = vmatpush.msra.mxu2 %v467_v28  ;;  %830 = vmatpush.msra.mxu3 %v467_v28 }
  0x7e   :  { %473 = vmatpush.msra.mxu2 %v466_v31  ;;  %831 = vmatpush.msra.mxu3 %v466_v31 }
  0x83   :  { %188 = vmatmul.f32.gmra.mxu0 %v100_v33  ;;  %v465_v33 = vld [vmem:[#allocation8 + $0x68] sm:$0xff] }
  0x84   :  { %474 = vmatpush.msra.mxu2 %v465_v33  ;;  %832 = vmatpush.msra.mxu3 %v465_v33 }
  0x86   :  { %475 = vmatpush.msra.mxu2 %v464_v34  ;;  %833 = vmatpush.msra.mxu3 %v464_v34 }
  0x88   :  { %476 = vmatpush.msra.mxu2 %v463_v35  ;;  %834 = vmatpush.msra.mxu3 %v463_v35 }
  0x8a   :  { %477 = vmatpush.msra.mxu2 %v462_v38  ;;  %835 = vmatpush.msra.mxu3 %v462_v38 }
  0x8b   :  { %191 = vmatmul.f32.gmra.mxu0 %v101_v39 }
  0x8c   :  { %478 = vmatpush.msra.mxu2 %v461_v40  ;;  %836 = vmatpush.msra.mxu3 %v461_v40 }
  0x8e   :  { %479 = vmatpush.msra.mxu2 %v460_v41  ;;  %837 = vmatpush.msra.mxu3 %v460_v41 }
  0x90   :  { %480 = vmatpush.msra.mxu2 %v459_v42  ;;  %838 = vmatpush.msra.mxu3 %v459_v42 }
  0x92   :  { %481 = vmatpush.msra.mxu2 %v458_v45  ;;  %839 = vmatpush.msra.mxu3 %v458_v45 }
  0x93   :  { %194 = vmatmul.f32.gmra.mxu0 %v102_v44 }
  0x94   :  { %482 = vmatpush.msra.mxu2 %v457_v49  ;;  %840 = vmatpush.msra.mxu3 %v457_v49 }
  0x96   :  { %483 = vmatpush.msra.mxu2 %v456_v51  ;;  %841 = vmatpush.msra.mxu3 %v456_v51 }
  0x9b   :  { %197 = vmatmul.f32.gmra.mxu0 %v103_v48 }
  0xa3   :  { %200 = vmatmul.f32.gmra.mxu0 %v104_v50 }
  0xab   :  { %203 = vmatmul.f32.gmra.mxu0 %v105_v52  ;;  %v455_v52 = vld [vmem:[#allocation8 + $0x18] sm:$0xff] }
  0xac   :  { %484 = vmatpush.msra.mxu2 %v455_v52  ;;  %842 = vmatpush.msra.mxu3 %v455_v52 }
  0xb0   :  { %v159_v55 = vpop.f32.mrf.mxu0 }
  0xb1   :  { %v160_v57 = vadd.f32 %v1186_v53, %v159_v55 }
  0xb3   :  { %v255_v58 = vmax.f32 %v160_v57, 0.0  ;;  %206 = vmatmul.f32.gmra.mxu0 %v106_v56  ;;  %v454_v56 = vld [vmem:[#allocation8 + $0x10] sm:$0xff] }
  0xb4   :  { %485 = vmatpush.msra.mxu2 %v454_v56  ;;  %843 = vmatpush.msra.mxu3 %v454_v56 }
  0xb5   :  { %323 = vmatmul.f32.vlgmr.msra.gmra.mxu1 %v255_v58 }
  0xb6   :  { %v231_v46 = vpop.f32.mrf.mxu3 }
  0xb7   :  { %v232_v48 = vadd.f32 %v1186_v53, %v231_v46 }
  0xb8   :  { %v162_v60 = vpop.f32.mrf.mxu0 }
  0xb9   :  { %v163_v62 = vadd.f32 %v1186_v53, %v162_v60  ;;  %v279_v50 = vmax.f32 %v232_v48, 0.0  ;;  %v453_v60 = vld [vmem:[#allocation8 + $0x8] sm:$0xff] }
  0xba   :  { %486 = vmatpush.msra.mxu2 %v453_v60  ;;  %844 = vmatpush.msra.mxu3 %v453_v60 }
  0xbb   :  { %v256_v63 = vmax.f32 %v163_v62, 0.0  ;;  %209 = vmatmul.f32.gmra.mxu0 %v107_v61  ;;  %395 = vmatmul.f32.vlgmr.msrb.gmra.mxu3 %v279_v50  ;;  %v452_v62 = vld [vmem:[#allocation8] sm:$0xff] }
  0xbc   :  { %487 = vmatpush.msra.mxu2 %v452_v62  ;;  %845 = vmatpush.msra.mxu3 %v452_v62 }
  0xbd   :  { %326 = vmatmul.f32.gmra.mxu1 %v256_v63 }
  0xbe   :  { %v234_v57 = vpop.f32.mrf.mxu3 }
  0xbf   :  { %v235_v59 = vadd.f32 %v1186_v53, %v234_v57 }
  0xc0   :  { %v165_v1 = vpop.f32.mrf.mxu0 }
  0xc1   :  { %v166_v3 = vadd.f32 %v1186_v53, %v165_v1  ;;  %v280_v61 = vmax.f32 %v235_v59, 0.0 }
  0xc3   :  { %v257_v4 = vmax.f32 %v166_v3, 0.0  ;;  %212 = vmatmul.f32.gmra.mxu0 %v108_v2  ;;  %398 = vmatmul.f32.gmra.mxu3 %v280_v61 }
  0xc5   :  { %329 = vmatmul.f32.gmra.mxu1 %v257_v4 }
  0xc6   :  { %v237_v1 = vpop.f32.mrf.mxu3 }
  0xc7   :  { %v238_v3 = vadd.f32 %v1186_v53, %v237_v1 }
  0xc8   :  { %v168_v5 = vpop.f32.mrf.mxu0 }
  0xc9   :  { %v169_v7 = vadd.f32 %v1186_v53, %v168_v5  ;;  %v281_v4 = vmax.f32 %v238_v3, 0.0 }
  0xcb   :  { %v258_v8 = vmax.f32 %v169_v7, 0.0  ;;  %215 = vmatmul.f32.gmra.mxu0 %v109_v6  ;;  %401 = vmatmul.f32.gmra.mxu3 %v281_v4 }
  0xcd   :  { %332 = vmatmul.f32.gmra.mxu1 %v258_v8 }
  0xce   :  { %v240_v7 = vpop.f32.mrf.mxu3 }
  0xd0   :  { %v171_v9 = vpop.f32.mrf.mxu0 }
  0xd1   :  { %v172_v11 = vadd.f32 %v1186_v53, %v171_v9  ;;  %v241_v9 = vadd.f32 %v1186_v53, %v240_v7 }
  0xd3   :  { %v259_v12 = vmax.f32 %v172_v11, 0.0  ;;  %218 = vmatmul.f32.gmra.mxu0 %v110_v10  ;;  %v282_v10 = vmax.f32 %v241_v9, 0.0 }
  0xd5   :  { %335 = vmatmul.f32.gmra.mxu1 %v259_v12  ;;  %404 = vmatmul.f32.gmra.mxu3 %v282_v10 }
  0xd8   :  { %v174_v13 = vpop.f32.mrf.mxu0 }
  0xd9   :  { %v175_v15 = vadd.f32 %v1186_v53, %v174_v13  ;;  %v243_v13 = vpop.f32.mrf.mxu3 }
  0xdb   :  { %v260_v16 = vmax.f32 %v175_v15, 0.0  ;;  %221 = vmatmul.f32.gmra.mxu0 %v111_v14  ;;  %v244_v15 = vadd.f32 %v1186_v53, %v243_v13 }
  0xdd   :  { %338 = vmatmul.f32.gmra.mxu1 %v260_v16  ;;  %v283_v16 = vmax.f32 %v244_v15, 0.0 }
  0xdf   :  { %407 = vmatmul.f32.gmra.mxu3 %v283_v16 }
  0xe0   :  { %v177_v17 = vpop.f32.mrf.mxu0 }
  0xe1   :  { %v178_v19 = vadd.f32 %v1186_v53, %v177_v17  ;;  %v1212_v17 = vld [vmem:[%s1304_s4] ss:$0 sm:$0xff] }
  0xe3   :  { %v261_v20 = vmax.f32 %v178_v19, 0.0  ;;  %224 = vmatmul.f32.gmra.mxu0 %v112_v18 }
  0xe5   :  { %341 = vmatmul.f32.gmra.mxu1 %v261_v20 }
  0xe8   :  { %v180_v21 = vpop.f32.mrf.mxu0 }
  0xe9   :  { %v181_v23 = vadd.f32 %v1186_v53, %v180_v21  ;;  %v246_v21 = vpop.f32.mrf.mxu3 }
  0xeb   :  { %v262_v24 = vmax.f32 %v181_v23, 0.0  ;;  %227 = vmatmul.f32.gmra.mxu0 %v113_v22 }
  0xed   :  { %344 = vmatmul.f32.gmra.mxu1 %v262_v24  ;;  %v247_v24 = vadd.f32 %v1186_v53, %v246_v21 }
  0xf0   :  { %v183_v25 = vpop.f32.mrf.mxu0 }
  0xf1   :  { %v184_v26 = vadd.f32 %v1186_v53, %v183_v25 }
  0xf3   :  { %v263_v27 = vmax.f32 %v184_v26, 0.0  ;;  %v284_v26 = vmax.f32 %v247_v24, 0.0 }
  0xf5   :  { %347 = vmatmul.f32.gmra.mxu1 %v263_v27  ;;  %410 = vmatmul.f32.gmra.mxu3 %v284_v26 }
  0xf8   :  { %v186_v29 = vpop.f32.mrf.mxu0 }
  0xf9   :  { %v187_v30 = vadd.f32 %v1186_v53, %v186_v29 }
  0xfb   :  { %v264_v32 = vmax.f32 %v187_v30, 0.0  ;;  %v249_v30 = vpop.f32.mrf.mxu3 }
  0xfc   :  { %v250_v33 = vadd.f32 %v1186_v53, %v249_v30 }
  0xfd   :  { %350 = vmatmul.f32.gmra.mxu1 %v264_v32 }
  0xfe   :  { %v285_v35 = vmax.f32 %v250_v33, 0.0 }
 0x100   :  { %v189_v36 = vpop.f32.mrf.mxu0  ;;  %413 = vmatmul.f32.gmra.mxu3 %v285_v35 }
 0x101   :  { %v190_v37 = vadd.f32 %v1186_v53, %v189_v36 }
 0x103   :  { %v265_v39 = vmax.f32 %v190_v37, 0.0 }
 0x105   :  { %353 = vmatmul.f32.gmra.mxu1 %v265_v39  ;;  %v252_v39 = vpop.f32.mrf.mxu3 }
 0x106   :  { %v253_v42 = vadd.f32 %v1186_v53, %v252_v39 }
 0x108   :  { %v192_v43 = vpop.f32.mrf.mxu0 }
 0x109   :  { %v193_v44 = vadd.f32 %v1186_v53, %v192_v43 }
 0x10b   :  { %v266_v47 = vmax.f32 %v193_v44, 0.0  ;;  %v286_v44 = vmax.f32 %v253_v42, 0.0 }
 0x10d   :  { %356 = vmatmul.f32.gmra.mxu1 %v266_v47  ;;  %416 = vmatmul.f32.gmra.mxu3 %v286_v44 }
 0x110   :  { %v195_v54 = vpop.f32.mrf.mxu0 }
 0x111   :  { %v196_v55 = vadd.f32 %v1186_v53, %v195_v54 }
 0x113   :  { %v267_v58 = vmax.f32 %v196_v55, 0.0 }
 0x115   :  { %359 = vmatmul.f32.gmra.mxu1 %v267_v58 }
 0x118   :  { %v198_v63 = vpop.f32.mrf.mxu0 }
 0x119   :  { %v199_v0 = vadd.f32 %v1186_v53, %v198_v63 }
 0x11b   :  { %v268_v2 = vmax.f32 %v199_v0, 0.0 }
 0x11d   :  { %362 = vmatmul.f32.gmra.mxu1 %v268_v2 }
 0x120   :  { %v201_v5 = vpop.f32.mrf.mxu0 }
 0x121   :  { %v202_v6 = vadd.f32 %v1186_v53, %v201_v5 }
 0x123   :  { %v269_v8 = vmax.f32 %v202_v6, 0.0 }
 0x125   :  { %365 = vmatmul.f32.gmra.mxu1 %v269_v8 }
 0x128   :  { %v204_v11 = vpop.f32.mrf.mxu0 }
 0x129   :  { %v205_v12 = vadd.f32 %v1186_v53, %v204_v11 }
 0x12b   :  { %v270_v14 = vmax.f32 %v205_v12, 0.0 }
 0x12d   :  { %368 = vmatmul.f32.gmra.mxu1 %v270_v14 }
 0x130   :  { %v207_v18 = vpop.f32.mrf.mxu0 }
 0x131   :  { %v208_v19 = vadd.f32 %v1186_v53, %v207_v18 }
 0x132   :  { %v324_v20 = vpop.f32.mrf.mxu1 }
 0x133   :  { %v271_v22 = vmax.f32 %v208_v19, 0.0  ;;  %v325_v23 = vadd.f32 %v1212_v17, %v324_v20 }
 0x135   :  { %v420_v25 = vmax.f32 %v325_v23, 0.0  ;;  %371 = vmatmul.f32.gmra.mxu1 %v271_v22 }
 0x137   :  { %488 = vmatmul.f32.vlgmr.msra.gmra.mxu2 %v420_v25 }
 0x138   :  { %v210_v27 = vpop.f32.mrf.mxu0 }
 0x139   :  { %v211_v28 = vadd.f32 %v1186_v53, %v210_v27 }
 0x13a   :  { %v327_v29 = vpop.f32.mrf.mxu1 }
 0x13b   :  { %v272_v31 = vmax.f32 %v211_v28, 0.0  ;;  %v328_v32 = vadd.f32 %v1212_v17, %v327_v29 }
 0x13d   :  { %v421_v34 = vmax.f32 %v328_v32, 0.0  ;;  %374 = vmatmul.f32.gmra.mxu1 %v272_v31 }
 0x13e   :  { %v396_v25 = vpop.f32.mrf.mxu3 }
 0x13f   :  { %491 = vmatmul.f32.gmra.mxu2 %v421_v34  ;;  %v397_v27 = vadd.f32 %v1212_v17, %v396_v25 }
 0x140   :  { %v213_v36 = vpop.f32.mrf.mxu0 }
 0x141   :  { %v214_v37 = vadd.f32 %v1186_v53, %v213_v36  ;;  %v444_v29 = vmax.f32 %v397_v27, 0.0 }
 0x142   :  { %v330_v38 = vpop.f32.mrf.mxu1 }
 0x143   :  { %v273_v40 = vmax.f32 %v214_v37, 0.0  ;;  %v331_v41 = vadd.f32 %v1212_v17, %v330_v38  ;;  %560 = vmatmul.f32.vlgmr.msra.gmra.mxu3 %v444_v29 }
 0x145   :  { %v422_v43 = vmax.f32 %v331_v41, 0.0  ;;  %377 = vmatmul.f32.gmra.mxu1 %v273_v40 }
 0x146   :  { %v399_v31 = vpop.f32.mrf.mxu3 }
 0x147   :  { %494 = vmatmul.f32.gmra.mxu2 %v422_v43  ;;  %v400_v33 = vadd.f32 %v1212_v17, %v399_v31 }
 0x148   :  { %v216_v45 = vpop.f32.mrf.mxu0 }
 0x149   :  { %v217_v46 = vadd.f32 %v1186_v53, %v216_v45  ;;  %v445_v35 = vmax.f32 %v400_v33, 0.0 }
 0x14a   :  { %v333_v47 = vpop.f32.mrf.mxu1 }
 0x14b   :  { %v274_v48 = vmax.f32 %v217_v46, 0.0  ;;  %v334_v49 = vadd.f32 %v1212_v17, %v333_v47  ;;  %563 = vmatmul.f32.gmra.mxu3 %v445_v35 }
 0x14d   :  { %v423_v50 = vmax.f32 %v334_v49, 0.0  ;;  %380 = vmatmul.f32.gmra.mxu1 %v274_v48 }
 0x14e   :  { %v402_v37 = vpop.f32.mrf.mxu3 }
 0x14f   :  { %497 = vmatmul.f32.gmra.mxu2 %v423_v50  ;;  %v403_v39 = vadd.f32 %v1212_v17, %v402_v37 }
 0x150   :  { %v219_v51 = vpop.f32.mrf.mxu0 }
 0x151   :  { %v220_v52 = vadd.f32 %v1186_v53, %v219_v51  ;;  %v446_v41 = vmax.f32 %v403_v39, 0.0 }
 0x152   :  { %v336_v54 = vpop.f32.mrf.mxu1 }
 0x153   :  { %v275_v55 = vmax.f32 %v220_v52, 0.0  ;;  %v337_v56 = vadd.f32 %v1212_v17, %v336_v54  ;;  %566 = vmatmul.f32.gmra.mxu3 %v446_v41 }
 0x155   :  { %v424_v57 = vmax.f32 %v337_v56, 0.0  ;;  %383 = vmatmul.f32.gmra.mxu1 %v275_v55  ;;  %v1250_v55 = vld [vmem:[%s1306_s6] ss:$0 sm:$0xff]  ;;  %s1118_s6 = smov [#allocation10]  }
 0x156   :  { %s781_s23 = sshll.u32 %s1118_s6, 4  ;;  %s782_s23 = int_to_ptr.vmem [resolvable:$true] %s781_s23 }
 0x157   :  { %500 = vmatmul.f32.gmra.mxu2 %v424_v57 }
 0x158   :  { %v222_v58 = vpop.f32.mrf.mxu0  ;;  %v405_v43 = vpop.f32.mrf.mxu3 }
 0x159   :  { %v223_v59 = vadd.f32 %v1186_v53, %v222_v58  ;;  %v406_v45 = vadd.f32 %v1212_v17, %v405_v43 }
 0x15a   :  { %v339_v60 = vpop.f32.mrf.mxu1 }
 0x15b   :  { %v276_v61 = vmax.f32 %v223_v59, 0.0  ;;  %v340_v62 = vadd.f32 %v1212_v17, %v339_v60  ;;  %v447_v47 = vmax.f32 %v406_v45, 0.0 }
 0x15d   :  { %v425_v63 = vmax.f32 %v340_v62, 0.0  ;;  %386 = vmatmul.f32.gmra.mxu1 %v276_v61  ;;  %569 = vmatmul.f32.gmra.mxu3 %v447_v47 }
 0x15f   :  { %503 = vmatmul.f32.gmra.mxu2 %v425_v63 }
 0x160   :  { %v225_v0 = vpop.f32.mrf.mxu0 }
 0x161   :  { %v226_v1 = vadd.f32 %v1186_v53, %v225_v0 }
 0x162   :  { %v342_v2 = vpop.f32.mrf.mxu1  ;;  %v408_v49 = vpop.f32.mrf.mxu3 }
 0x163   :  { %v277_v3 = vmax.f32 %v226_v1, 0.0  ;;  %v343_v4 = vadd.f32 %v1212_v17, %v342_v2  ;;  %v409_v51 = vadd.f32 %v1212_v17, %v408_v49 }
 0x165   :  { %v426_v5 = vmax.f32 %v343_v4, 0.0  ;;  %389 = vmatmul.f32.gmra.mxu1 %v277_v3  ;;  %v448_v54 = vmax.f32 %v409_v51, 0.0 }
 0x167   :  { %506 = vmatmul.f32.gmra.mxu2 %v426_v5  ;;  %572 = vmatmul.f32.gmra.mxu3 %v448_v54 }
 0x168   :  { %v228_v6 = vpop.f32.mrf.mxu0 }
 0x169   :  { %v229_v7 = vadd.f32 %v1186_v53, %v228_v6 }
 0x16a   :  { %v345_v8 = vpop.f32.mrf.mxu1 }
 0x16b   :  { %v278_v9 = vmax.f32 %v229_v7, 0.0  ;;  %v346_v10 = vadd.f32 %v1212_v17, %v345_v8 }
 0x16d   :  { %v427_v11 = vmax.f32 %v346_v10, 0.0  ;;  %392 = vmatmul.f32.gmra.mxu1 %v278_v9 }
 0x16f   :  { %509 = vmatmul.f32.gmra.mxu2 %v427_v11 }
 0x172   :  { %v348_v12 = vpop.f32.mrf.mxu1 }
 0x173   :  { %v349_v13 = vadd.f32 %v1212_v17, %v348_v12 }
 0x175   :  { %v428_v14 = vmax.f32 %v349_v13, 0.0 }
 0x177   :  { %512 = vmatmul.f32.gmra.mxu2 %v428_v14 }
 0x178   :  { %v411_v60 = vpop.f32.mrf.mxu3 }
 0x179   :  { %v412_v61 = vadd.f32 %v1212_v17, %v411_v60 }
 0x17a   :  { %v351_v15 = vpop.f32.mrf.mxu1 }
 0x17b   :  { %v352_v16 = vadd.f32 %v1212_v17, %v351_v15  ;;  %v449_v0 = vmax.f32 %v412_v61, 0.0 }
 0x17d   :  { %v429_v18 = vmax.f32 %v352_v16, 0.0  ;;  %575 = vmatmul.f32.gmra.mxu3 %v449_v0 }
 0x17f   :  { %515 = vmatmul.f32.gmra.mxu2 %v429_v18 }
 0x182   :  { %v354_v19 = vpop.f32.mrf.mxu1 }
 0x183   :  { %v355_v53 = vadd.f32 %v1212_v17, %v354_v19  ;;  %v414_v6 = vpop.f32.mrf.mxu3 }
 0x184   :  { %v415_v7 = vadd.f32 %v1212_v17, %v414_v6 }
 0x185   :  { %v430_v20 = vmax.f32 %v355_v53, 0.0 }
 0x186   :  { %v450_v10 = vmax.f32 %v415_v7, 0.0 }
 0x187   :  { %518 = vmatmul.f32.gmra.mxu2 %v430_v20 }
 0x188   :  { %578 = vmatmul.f32.gmra.mxu3 %v450_v10 }
 0x18a   :  { %v357_v21 = vpop.f32.mrf.mxu1 }
 0x18b   :  { %v358_v22 = vadd.f32 %v1212_v17, %v357_v21 }
 0x18d   :  { %v431_v23 = vmax.f32 %v358_v22, 0.0 }
 0x18f   :  { %521 = vmatmul.f32.gmra.mxu2 %v431_v23 }
 0x190   :  { %v417_v19 = vpop.f32.mrf.mxu3 }
 0x191   :  { %v418_v53 = vadd.f32 %v1212_v17, %v417_v19 }
 0x192   :  { %v360_v24 = vpop.f32.mrf.mxu1 }
 0x193   :  { %v361_v26 = vadd.f32 %v1212_v17, %v360_v24  ;;  %v451_v22 = vmax.f32 %v418_v53, 0.0 }
 0x195   :  { %v432_v28 = vmax.f32 %v361_v26, 0.0  ;;  %581 = vmatmul.f32.gmra.mxu3 %v451_v22 }
 0x197   :  { %524 = vmatmul.f32.gmra.mxu2 %v432_v28 }
 0x19a   :  { %v363_v30 = vpop.f32.mrf.mxu1 }
 0x19b   :  { %v364_v32 = vadd.f32 %v1212_v17, %v363_v30 }
 0x19d   :  { %v433_v34 = vmax.f32 %v364_v32, 0.0 }
 0x19f   :  { %527 = vmatmul.f32.gmra.mxu2 %v433_v34 }
 0x1a2   :  { %v366_v36 = vpop.f32.mrf.mxu1 }
 0x1a3   :  { %v367_v38 = vadd.f32 %v1212_v17, %v366_v36 }
 0x1a5   :  { %v434_v40 = vmax.f32 %v367_v38, 0.0 }
 0x1a7   :  { %530 = vmatmul.f32.gmra.mxu2 %v434_v40 }
 0x1aa   :  { %v369_v42 = vpop.f32.mrf.mxu1 }
 0x1ab   :  { %v370_v44 = vadd.f32 %v1212_v17, %v369_v42 }
 0x1ad   :  { %v435_v46 = vmax.f32 %v370_v44, 0.0 }
 0x1af   :  { %533 = vmatmul.f32.gmra.mxu2 %v435_v46 }
 0x1b2   :  { %v372_v48 = vpop.f32.mrf.mxu1 }
 0x1b3   :  { %v373_v50 = vadd.f32 %v1212_v17, %v372_v48 }
 0x1b5   :  { %v436_v52 = vmax.f32 %v373_v50, 0.0 }
 0x1b7   :  { %536 = vmatmul.f32.gmra.mxu2 %v436_v52 }
 0x1ba   :  { %v375_v56 = vpop.f32.mrf.mxu1  ;;  %v489_v57 = vpop.f32.mrf.mxu2 }
 0x1bb   :  { %v376_v58 = vadd.f32 %v1212_v17, %v375_v56  ;;  %v490_v59 = vadd.f32 %v1250_v55, %v489_v57 }
 0x1bd   :  { %v437_v62 = vmax.f32 %v376_v58, 0.0  ;;  %v585_v63 = vsub.f32 0.0, %v490_v59 }
 0x1bf   :  { %v617_v1 = vmul.f32 1.442695, %v585_v63  ;;  %539 = vmatmul.f32.gmra.mxu2 %v437_v62 }
 0x1c1   :  { %856 = vpow2.f32 %v617_v1 }
 0x1c2   :  { %v378_v2 = vpop.f32.mrf.mxu1  ;;  %v492_v3 = vpop.f32.mrf.mxu2 }
 0x1c3   :  { %v379_v4 = vadd.f32 %v1212_v17, %v378_v2  ;;  %v493_v5 = vadd.f32 %v1250_v55, %v492_v3 }
 0x1c5   :  { %v438_v8 = vmax.f32 %v379_v4, 0.0  ;;  %v586_v9 = vsub.f32 0.0, %v493_v5 }
 0x1c7   :  { %v857_v11 = vpop.eup %856  ;;  %v619_v12 = vmul.f32 1.442695, %v586_v9  ;;  %542 = vmatmul.f32.gmra.mxu2 %v438_v8 }
 0x1c8   :  { %v681_v13 = vadd.f32 1.0, %v857_v11 }
 0x1c9   :  { %858 = vpow2.f32 %v619_v12 }
 0x1ca   :  { %860 = vrcp.f32 %v681_v13  ;;  %v381_v14 = vpop.f32.mrf.mxu1  ;;  %v495_v15 = vpop.f32.mrf.mxu2 }
 0x1cb   :  { %v382_v16 = vadd.f32 %v1212_v17, %v381_v14  ;;  %v496_v18 = vadd.f32 %v1250_v55, %v495_v15 }
 0x1cd   :  { %v439_v20 = vmax.f32 %v382_v16, 0.0  ;;  %v587_v21 = vsub.f32 0.0, %v496_v18 }
 0x1cf   :  { %v859_v23 = vpop.eup %858  ;;  %v621_v24 = vmul.f32 1.442695, %v587_v21  ;;  %545 = vmatmul.f32.gmra.mxu2 %v439_v20 }
 0x1d0   :  { %v861_v25 = vpop.eup %860  ;;  %v682_v26 = vadd.f32 1.0, %v859_v23 }
 0x1d1   :  { %745 = vst [vmem:[#allocation10] sm:$0xff] %v861_v25  ;;  %862 = vpow2.f32 %v621_v24 }
 0x1d2   :  { %864 = vrcp.f32 %v682_v26  ;;  %v384_v27 = vpop.f32.mrf.mxu1  ;;  %v498_v28 = vpop.f32.mrf.mxu2 }
 0x1d3   :  { %v385_v29 = vadd.f32 %v1212_v17, %v384_v27  ;;  %v499_v30 = vadd.f32 %v1250_v55, %v498_v28 }
 0x1d5   :  { %v440_v31 = vmax.f32 %v385_v29, 0.0  ;;  %v588_v32 = vsub.f32 0.0, %v499_v30 }
 0x1d7   :  { %v863_v33 = vpop.eup %862  ;;  %v623_v34 = vmul.f32 1.442695, %v588_v32  ;;  %548 = vmatmul.f32.gmra.mxu2 %v440_v31 }
 0x1d8   :  { %v865_v35 = vpop.eup %864  ;;  %v683_v36 = vadd.f32 1.0, %v863_v33 }
 0x1d9   :  { %746 = vst [vmem:[#allocation10 + $0x8] sm:$0xff] %v865_v35  ;;  %866 = vpow2.f32 %v623_v34 }
 0x1da   :  { %868 = vrcp.f32 %v683_v36  ;;  %v387_v37 = vpop.f32.mrf.mxu1  ;;  %v501_v38 = vpop.f32.mrf.mxu2 }
 0x1db   :  { %v388_v39 = vadd.f32 %v1212_v17, %v387_v37  ;;  %v502_v40 = vadd.f32 %v1250_v55, %v501_v38 }
 0x1dd   :  { %v441_v41 = vmax.f32 %v388_v39, 0.0  ;;  %v589_v42 = vsub.f32 0.0, %v502_v40  ;;  %v561_v40 = vpop.f32.mrf.mxu3 }
 0x1df   :  { %v867_v43 = vpop.eup %866  ;;  %v625_v44 = vmul.f32 1.442695, %v589_v42  ;;  %551 = vmatmul.f32.gmra.mxu2 %v441_v41  ;;  %v562_v42 = vadd.f32 %v1250_v55, %v561_v40 }
 0x1e0   :  { %v869_v45 = vpop.eup %868  ;;  %v684_v46 = vadd.f32 1.0, %v867_v43 }
 0x1e1   :  { %747 = vst [vmem:[#allocation10 + $0x10] sm:$0xff] %v869_v45  ;;  %870 = vpow2.f32 %v625_v44  ;;  %v609_v44 = vsub.f32 0.0, %v562_v42 }
 0x1e2   :  { %872 = vrcp.f32 %v684_v46  ;;  %v390_v47 = vpop.f32.mrf.mxu1  ;;  %v504_v48 = vpop.f32.mrf.mxu2 }
 0x1e3   :  { %v391_v49 = vadd.f32 %v1212_v17, %v390_v47  ;;  %v505_v50 = vadd.f32 %v1250_v55, %v504_v48  ;;  %v665_v47 = vmul.f32 1.442695, %v609_v44 }
 0x1e5   :  { %v442_v51 = vmax.f32 %v391_v49, 0.0  ;;  %v590_v52 = vsub.f32 0.0, %v505_v50 }
 0x1e7   :  { %v871_v54 = vpop.eup %870  ;;  %v627_v56 = vmul.f32 1.442695, %v590_v52  ;;  %554 = vmatmul.f32.gmra.mxu2 %v442_v51  ;;  %v564_v51 = vpop.f32.mrf.mxu3 }
 0x1e8   :  { %v873_v57 = vpop.eup %872  ;;  %v685_v58 = vadd.f32 1.0, %v871_v54  ;;  %v565_v54 = vadd.f32 %v1250_v55, %v564_v51 }
 0x1e9   :  { %748 = vst [vmem:[#allocation10 + $0x18] sm:$0xff] %v873_v57  ;;  %874 = vpow2.f32 %v627_v56 }
 0x1ea   :  { %876 = vrcp.f32 %v685_v58  ;;  %v393_v59 = vpop.f32.mrf.mxu1  ;;  %v507_v60 = vpop.f32.mrf.mxu2  ;;  %v610_v57 = vsub.f32 0.0, %v565_v54 }
 0x1eb   :  { %v394_v61 = vadd.f32 %v1212_v17, %v393_v59  ;;  %v508_v62 = vadd.f32 %v1250_v55, %v507_v60 }
 0x1ec   :  { %v667_v60 = vmul.f32 1.442695, %v610_v57 }
 0x1ed   :  { %v443_v63 = vmax.f32 %v394_v61, 0.0  ;;  %v591_v0 = vsub.f32 0.0, %v508_v62 }
 0x1ef   :  { %v875_v1 = vpop.eup %874  ;;  %v629_v2 = vmul.f32 1.442695, %v591_v0  ;;  %557 = vmatmul.f32.gmra.mxu2 %v443_v63 }
 0x1f0   :  { %v877_v3 = vpop.eup %876  ;;  %v686_v4 = vadd.f32 1.0, %v875_v1 }
 0x1f1   :  { %749 = vst [vmem:[#allocation10 + $0x20] sm:$0xff] %v877_v3  ;;  %878 = vpow2.f32 %v629_v2  ;;  %v567_v2 = vpop.f32.mrf.mxu3 }
 0x1f2   :  { %880 = vrcp.f32 %v686_v4  ;;  %v510_v5 = vpop.f32.mrf.mxu2  ;;  %v568_v4 = vadd.f32 %v1250_v55, %v567_v2 }
 0x1f3   :  { %v511_v6 = vadd.f32 %v1250_v55, %v510_v5 }
 0x1f5   :  { %v592_v7 = vsub.f32 0.0, %v511_v6  ;;  %v611_v6 = vsub.f32 0.0, %v568_v4 }
 0x1f7   :  { %v879_v8 = vpop.eup %878  ;;  %v631_v9 = vmul.f32 1.442695, %v592_v7 }
 0x1f8   :  { %v881_v10 = vpop.eup %880  ;;  %v687_v17 = vadd.f32 1.0, %v879_v8 }
 0x1f9   :  { %750 = vst [vmem:[#allocation10 + $0x28] sm:$0xff] %v881_v10  ;;  %882 = vpow2.f32 %v631_v9  ;;  %v669_v9 = vmul.f32 1.442695, %v611_v6 }
 0x1fa   :  { %884 = vrcp.f32 %v687_v17  ;;  %v513_v11 = vpop.f32.mrf.mxu2 }
 0x1fb   :  { %v514_v12 = vadd.f32 %v1250_v55, %v513_v11 }
 0x1fd   :  { %v593_v13 = vsub.f32 0.0, %v514_v12 }
 0x1ff   :  { %v883_v14 = vpop.eup %882  ;;  %v633_v15 = vmul.f32 1.442695, %v593_v13 }
 0x200   :  { %v885_v16 = vpop.eup %884  ;;  %v688_v18 = vadd.f32 1.0, %v883_v14 }
 0x201   :  { %751 = vst [vmem:[#allocation10 + $0x30] sm:$0xff] %v885_v16  ;;  %886 = vpow2.f32 %v633_v15  ;;  %v570_v15 = vpop.f32.mrf.mxu3 }
 0x202   :  { %888 = vrcp.f32 %v688_v18  ;;  %v516_v19 = vpop.f32.mrf.mxu2  ;;  %v571_v18 = vadd.f32 %v1250_v55, %v570_v15 }
 0x203   :  { %v517_v53 = vadd.f32 %v1250_v55, %v516_v19 }
 0x205   :  { %v594_v20 = vsub.f32 0.0, %v517_v53  ;;  %v612_v53 = vsub.f32 0.0, %v571_v18 }
 0x207   :  { %v887_v21 = vpop.eup %886  ;;  %v635_v22 = vmul.f32 1.442695, %v594_v20 }
 0x208   :  { %v889_v23 = vpop.eup %888  ;;  %v689_v24 = vadd.f32 1.0, %v887_v21 }
 0x209   :  { %752 = vst [vmem:[#allocation10 + $0x38] sm:$0xff] %v889_v23  ;;  %890 = vpow2.f32 %v635_v22  ;;  %v671_v22 = vmul.f32 1.442695, %v612_v53 }
 0x20a   :  { %892 = vrcp.f32 %v689_v24  ;;  %v519_v25 = vpop.f32.mrf.mxu2 }
 0x20b   :  { %v520_v26 = vadd.f32 %v1250_v55, %v519_v25 }
 0x20d   :  { %v595_v27 = vsub.f32 0.0, %v520_v26 }
 0x20f   :  { %v891_v28 = vpop.eup %890  ;;  %v637_v29 = vmul.f32 1.442695, %v595_v27 }
 0x210   :  { %v893_v30 = vpop.eup %892  ;;  %v690_v31 = vadd.f32 1.0, %v891_v28 }
 0x211   :  { %753 = vst [vmem:[#allocation10 + $0x40] sm:$0xff] %v893_v30  ;;  %894 = vpow2.f32 %v637_v29  ;;  %v573_v29 = vpop.f32.mrf.mxu3 }
 0x212   :  { %896 = vrcp.f32 %v690_v31  ;;  %v522_v32 = vpop.f32.mrf.mxu2  ;;  %v574_v31 = vadd.f32 %v1250_v55, %v573_v29 }
 0x213   :  { %v523_v33 = vadd.f32 %v1250_v55, %v522_v32 }
 0x215   :  { %v596_v34 = vsub.f32 0.0, %v523_v33  ;;  %v613_v33 = vsub.f32 0.0, %v574_v31 }
 0x217   :  { %v895_v35 = vpop.eup %894  ;;  %v639_v36 = vmul.f32 1.442695, %v596_v34 }
 0x218   :  { %v897_v37 = vpop.eup %896  ;;  %v691_v38 = vadd.f32 1.0, %v895_v35 }
 0x219   :  { %754 = vst [vmem:[#allocation10 + $0x48] sm:$0xff] %v897_v37  ;;  %898 = vpow2.f32 %v639_v36  ;;  %v673_v36 = vmul.f32 1.442695, %v613_v33  ;;  %v576_v44 = vpop.f32.mrf.mxu3 }
 0x21a   :  { %900 = vrcp.f32 %v691_v38  ;;  %v525_v39 = vpop.f32.mrf.mxu2 }
 0x21b   :  { %v526_v41 = vadd.f32 %v1250_v55, %v525_v39 }
 0x21d   :  { %v597_v43 = vsub.f32 0.0, %v526_v41 }
 0x21f   :  { %v899_v45 = vpop.eup %898  ;;  %v641_v46 = vmul.f32 1.442695, %v597_v43 }
 0x220   :  { %v901_v48 = vpop.eup %900  ;;  %v692_v49 = vadd.f32 1.0, %v899_v45  ;;  %v577_v45 = vadd.f32 %v1250_v55, %v576_v44 }
 0x221   :  { %755 = vst [vmem:[#allocation10 + $0x50] sm:$0xff] %v901_v48  ;;  %902 = vpow2.f32 %v641_v46 }
 0x222   :  { %904 = vrcp.f32 %v692_v49  ;;  %v528_v50 = vpop.f32.mrf.mxu2 }
 0x223   :  { %v529_v52 = vadd.f32 %v1250_v55, %v528_v50  ;;  %906 = vpow2.f32 %v665_v47  ;;  %v614_v47 = vsub.f32 0.0, %v577_v45 }
 0x225   :  { %v598_v56 = vsub.f32 0.0, %v529_v52  ;;  %v675_v52 = vmul.f32 1.442695, %v614_v47 }
 0x227   :  { %v903_v58 = vpop.eup %902  ;;  %v643_v59 = vmul.f32 1.442695, %v598_v56 }
 0x228   :  { %v905_v61 = vpop.eup %904  ;;  %v693_v62 = vadd.f32 1.0, %v903_v58 }
 0x229   :  { %v907_v63 = vpop.eup %906  ;;  %756 = vst [vmem:[#allocation10 + $0x58] sm:$0xff] %v905_v61  ;;  %908 = vpow2.f32 %v643_v59 }
 0x22a   :  { %910 = vrcp.f32 %v693_v62  ;;  %v531_v0 = vpop.f32.mrf.mxu2  ;;  %v705_v1 = vadd.f32 1.0, %v907_v63 }
 0x22b   :  { %v532_v3 = vadd.f32 %v1250_v55, %v531_v0  ;;  %912 = vpow2.f32 %v667_v60  ;;  %v579_v60 = vpop.f32.mrf.mxu3 }
 0x22c   :  { %914 = vrcp.f32 %v705_v1  ;;  %v580_v61 = vadd.f32 %v1250_v55, %v579_v60 }
 0x22d   :  { %v599_v5 = vsub.f32 0.0, %v532_v3 }
 0x22e   :  { %v615_v63 = vsub.f32 0.0, %v580_v61 }
 0x22f   :  { %v909_v7 = vpop.eup %908  ;;  %v645_v8 = vmul.f32 1.442695, %v599_v5 }
 0x230   :  { %v911_v10 = vpop.eup %910  ;;  %v694_v17 = vadd.f32 1.0, %v909_v7  ;;  %v677_v4 = vmul.f32 1.442695, %v615_v63 }
 0x231   :  { %v913_v11 = vpop.eup %912  ;;  %757 = vst [vmem:[#allocation10 + $0x60] sm:$0xff] %v911_v10  ;;  %916 = vpow2.f32 %v645_v8 }
 0x232   :  { %v915_v12 = vpop.eup %914  ;;  %918 = vrcp.f32 %v694_v17  ;;  %v534_v13 = vpop.f32.mrf.mxu2  ;;  %v706_v14 = vadd.f32 1.0, %v913_v11 }
 0x233   :  { %v535_v16 = vadd.f32 %v1250_v55, %v534_v13  ;;  %769 = vst [vmem:[#allocation10 + $0xc0] sm:$0xff] %v915_v12  ;;  %920 = vpow2.f32 %v669_v9  ;;  %v582_v10 = vpop.f32.mrf.mxu3 }
 0x234   :  { %922 = vrcp.f32 %v706_v14  ;;  %v583_v17 = vadd.f32 %v1250_v55, %v582_v10 }
 0x235   :  { %v600_v19 = vsub.f32 0.0, %v535_v16 }
 0x236   :  { %v616_v12 = vsub.f32 0.0, %v583_v17 }
 0x237   :  { %v917_v20 = vpop.eup %916  ;;  %v647_v21 = vmul.f32 1.442695, %v600_v19 }
 0x238   :  { %v919_v23 = vpop.eup %918  ;;  %v695_v24 = vadd.f32 1.0, %v917_v20  ;;  %v679_v18 = vmul.f32 1.442695, %v616_v12 }
 0x239   :  { %v921_v25 = vpop.eup %920  ;;  %758 = vst [vmem:[#allocation10 + $0x68] sm:$0xff] %v919_v23  ;;  %924 = vpow2.f32 %v647_v21 }
 0x23a   :  { %v923_v26 = vpop.eup %922  ;;  %926 = vrcp.f32 %v695_v24  ;;  %v537_v27 = vpop.f32.mrf.mxu2  ;;  %v707_v28 = vadd.f32 1.0, %v921_v25 }
 0x23b   :  { %v538_v30 = vadd.f32 %v1250_v55, %v537_v27  ;;  %770 = vst [vmem:[#allocation10 + $0xc8] sm:$0xff] %v923_v26  ;;  %928 = vpow2.f32 %v671_v22 }
 0x23c   :  { %930 = vrcp.f32 %v707_v28 }
 0x23d   :  { %v601_v32 = vsub.f32 0.0, %v538_v30 }
 0x23f   :  { %v925_v34 = vpop.eup %924  ;;  %v649_v35 = vmul.f32 1.442695, %v601_v32 }
 0x240   :  { %v927_v37 = vpop.eup %926  ;;  %v696_v38 = vadd.f32 1.0, %v925_v34 }
 0x241   :  { %v929_v39 = vpop.eup %928  ;;  %759 = vst [vmem:[#allocation10 + $0x70] sm:$0xff] %v927_v37  ;;  %932 = vpow2.f32 %v649_v35 }
 0x242   :  { %v931_v40 = vpop.eup %930  ;;  %934 = vrcp.f32 %v696_v38  ;;  %v540_v41 = vpop.f32.mrf.mxu2  ;;  %v708_v42 = vadd.f32 1.0, %v929_v39 }
 0x243   :  { %v541_v43 = vadd.f32 %v1250_v55, %v540_v41  ;;  %771 = vst [vmem:[#allocation10 + $0xd0] sm:$0xff] %v931_v40  ;;  %936 = vpow2.f32 %v673_v36 }
 0x244   :  { %938 = vrcp.f32 %v708_v42 }
 0x245   :  { %v602_v46 = vsub.f32 0.0, %v541_v43 }
 0x247   :  { %v933_v48 = vpop.eup %932  ;;  %v651_v49 = vmul.f32 1.442695, %v602_v46 }
 0x248   :  { %v935_v50 = vpop.eup %934  ;;  %v697_v51 = vadd.f32 1.0, %v933_v48 }
 0x249   :  { %v937_v54 = vpop.eup %936  ;;  %760 = vst [vmem:[#allocation10 + $0x78] sm:$0xff] %v935_v50  ;;  %940 = vpow2.f32 %v651_v49 }
 0x24a   :  { %v939_v56 = vpop.eup %938  ;;  %942 = vrcp.f32 %v697_v51  ;;  %v543_v57 = vpop.f32.mrf.mxu2  ;;  %v709_v58 = vadd.f32 1.0, %v937_v54 }
 0x24b   :  { %v544_v59 = vadd.f32 %v1250_v55, %v543_v57  ;;  %772 = vst [vmem:[#allocation10 + $0xd8] sm:$0xff] %v939_v56  ;;  %944 = vpow2.f32 %v675_v52 }
 0x24c   :  { %946 = vrcp.f32 %v709_v58 }
 0x24d   :  { %v603_v62 = vsub.f32 0.0, %v544_v59 }
 0x24f   :  { %v941_v0 = vpop.eup %940  ;;  %v653_v1 = vmul.f32 1.442695, %v603_v62 }
 0x250   :  { %v943_v2 = vpop.eup %942  ;;  %v698_v3 = vadd.f32 1.0, %v941_v0 }
 0x251   :  { %v945_v5 = vpop.eup %944  ;;  %761 = vst [vmem:[#allocation10 + $0x80] sm:$0xff] %v943_v2  ;;  %948 = vpow2.f32 %v653_v1 }
 0x252   :  { %v947_v6 = vpop.eup %946  ;;  %950 = vrcp.f32 %v698_v3  ;;  %v546_v7 = vpop.f32.mrf.mxu2  ;;  %v710_v8 = vadd.f32 1.0, %v945_v5 }
 0x253   :  { %v547_v9 = vadd.f32 %v1250_v55, %v546_v7  ;;  %773 = vst [vmem:[#allocation10 + $0xe0] sm:$0xff] %v947_v6  ;;  %952 = vpow2.f32 %v677_v4 }
 0x254   :  { %954 = vrcp.f32 %v710_v8 }
 0x255   :  { %v604_v11 = vsub.f32 0.0, %v547_v9 }
 0x257   :  { %v949_v13 = vpop.eup %948  ;;  %v655_v14 = vmul.f32 1.442695, %v604_v11 }
 0x258   :  { %v951_v15 = vpop.eup %950  ;;  %v699_v16 = vadd.f32 1.0, %v949_v13 }
 0x259   :  { %v953_v19 = vpop.eup %952  ;;  %762 = vst [vmem:[#allocation10 + $0x88] sm:$0xff] %v951_v15  ;;  %956 = vpow2.f32 %v655_v14 }
 0x25a   :  { %v955_v53 = vpop.eup %954  ;;  %958 = vrcp.f32 %v699_v16  ;;  %v549_v20 = vpop.f32.mrf.mxu2  ;;  %v711_v21 = vadd.f32 1.0, %v953_v19 }
 0x25b   :  { %v550_v22 = vadd.f32 %v1250_v55, %v549_v20  ;;  %774 = vst [vmem:[#allocation10 + $0xe8] sm:$0xff] %v955_v53  ;;  %960 = vpow2.f32 %v679_v18 }
 0x25c   :  { %962 = vrcp.f32 %v711_v21 }
 0x25d   :  { %v605_v23 = vsub.f32 0.0, %v550_v22 }
 0x25f   :  { %v957_v24 = vpop.eup %956  ;;  %v657_v25 = vmul.f32 1.442695, %v605_v23 }
 0x260   :  { %v959_v26 = vpop.eup %958  ;;  %v700_v27 = vadd.f32 1.0, %v957_v24 }
 0x261   :  { %v961_v28 = vpop.eup %960  ;;  %763 = vst [vmem:[#allocation10 + $0x90] sm:$0xff] %v959_v26  ;;  %964 = vpow2.f32 %v657_v25 }
 0x262   :  { %v963_v29 = vpop.eup %962  ;;  %966 = vrcp.f32 %v700_v27  ;;  %v552_v30 = vpop.f32.mrf.mxu2  ;;  %v712_v31 = vadd.f32 1.0, %v961_v28 }
 0x263   :  { %v553_v32 = vadd.f32 %v1250_v55, %v552_v30  ;;  %775 = vst [vmem:[#allocation10 + $0xf0] sm:$0xff] %v963_v29 }
 0x264   :  { %968 = vrcp.f32 %v712_v31 }
 0x265   :  { %v606_v33 = vsub.f32 0.0, %v553_v32 }
 0x267   :  { %v965_v34 = vpop.eup %964  ;;  %v659_v35 = vmul.f32 1.442695, %v606_v33 }
 0x268   :  { %v967_v36 = vpop.eup %966  ;;  %v701_v37 = vadd.f32 1.0, %v965_v34 }
 0x269   :  { %764 = vst [vmem:[#allocation10 + $0x98] sm:$0xff] %v967_v36  ;;  %970 = vpow2.f32 %v659_v35 }
 0x26a   :  { %v969_v38 = vpop.eup %968  ;;  %972 = vrcp.f32 %v701_v37  ;;  %v555_v39 = vpop.f32.mrf.mxu2 }
 0x26b   :  { %v556_v40 = vadd.f32 %v1250_v55, %v555_v39  ;;  %776 = vst [vmem:[#allocation10 + $0xf8] sm:$0xff] %v969_v38 }
 0x26d   :  { %v607_v41 = vsub.f32 0.0, %v556_v40 }
 0x26f   :  { %v971_v42 = vpop.eup %970  ;;  %v661_v43 = vmul.f32 1.442695, %v607_v41 }
 0x270   :  { %v973_v44 = vpop.eup %972  ;;  %v702_v45 = vadd.f32 1.0, %v971_v42 }
 0x271   :  { %765 = vst [vmem:[#allocation10 + $0xa0] sm:$0xff] %v973_v44  ;;  %974 = vpow2.f32 %v661_v43 }
 0x272   :  { %976 = vrcp.f32 %v702_v45  ;;  %v558_v46 = vpop.f32.mrf.mxu2 }
 0x273   :  { %v559_v47 = vadd.f32 %v1250_v55, %v558_v46 }
 0x275   :  { %v608_v48 = vsub.f32 0.0, %v559_v47 }
 0x277   :  { %v975_v49 = vpop.eup %974  ;;  %v663_v50 = vmul.f32 1.442695, %v608_v48 }
 0x278   :  { %v977_v51 = vpop.eup %976  ;;  %v703_v52 = vadd.f32 1.0, %v975_v49 }
 0x279   :  { %766 = vst [vmem:[#allocation10 + $0xa8] sm:$0xff] %v977_v51  ;;  %978 = vpow2.f32 %v663_v50 }
 0x27a   :  { %980 = vrcp.f32 %v703_v52 }
 0x27f   :  { %v979_v54 = vpop.eup %978 }
 0x280   :  { %v981_v56 = vpop.eup %980  ;;  %v704_v57 = vadd.f32 1.0, %v979_v54 }
 0x281   :  { %767 = vst [vmem:[#allocation10 + $0xb0] sm:$0xff] %v981_v56 }
 0x282   :  { %982 = vrcp.f32 %v704_v57 }
 0x288   :  { %v983_v55 = vpop.eup %982 }
 0x289   :  { %768 = vst [vmem:[#allocation10 + $0xb8] sm:$0xff] %v983_v55 }
 0x28a   :  { %789 = dma.vmem_to_hbm [thread:$0]  %s782_s23, 4096, %s784_s26, [#allocation4], %s1113_s9, %s1113_s9, %s1114_s10  }
 0x28b   :  { %1110 = dma.done.wait [#allocation4], 4096  }
 0x28c   :  { %1111 = vsyncadd [#allocation4], 4294963200 }
 0x28d   :  { %794 = vsyncpa [#allocation3], 1 }
 0x28e   :  { %795 = vsyncpa [#allocation6], 1 }
 0x28f   :  { %796 = vsyncpa [#allocation9], 1 }
 0x290   :  { %797 = vsyncpa [#allocation4], 1 }

</bundles_post_ra>
